<compile_context>
chip_gen: v6e
topology: v6e:2x2x1
jax: 0.10.0
libtpu: 0.0.40
codegen_flags: <defaults>
</compile_context>

<pallas_src>
import jax
import jax.numpy as jnp
import numpy as np
from jax.experimental import pallas as pl
from jax.experimental.pallas import tpu as pltpu


# ---------------------------------------------------------------------------
# Kernel A: tiled matmul + bias   h = x @ W.T + b   (W in PyTorch [F_out, F_in])
# ---------------------------------------------------------------------------
def fc_matmul_kernel(x_ref, w_ref, b_ref, o_ref, acc_ref):
    @pl.when(pl.program_id(2) == 0)
    def _():
        acc_ref[...] = jnp.zeros_like(acc_ref)

    # x tile [tm, tk] . w tile [tn, tk], contracted on both axis-1  (== x @ w.T)
    acc_ref[...] += jax.lax.dot_general(
        x_ref[...], w_ref[...],
        dimension_numbers=(((1,), (1,)), ((), ())),
        preferred_element_type=jnp.float32,
    )

    @pl.when(pl.program_id(2) == pl.num_programs(2) - 1)
    def _():
        o_ref[...] = (acc_ref[...] + b_ref[...]).astype(o_ref.dtype)


def _pick_tile(dim, candidates):
    for c in candidates:
        if c <= dim and dim % c == 0:
            return c
    return dim  # full extent is always a legal block size


def _fc_projection(x, w, b):
    m, k = x.shape
    n = w.shape[0]
    # Prefer 256-multiples (v6e / v7x 2x256^2 MXU); fall back to 128 / full dim.
    tm = _pick_tile(m, (256, 128, 64, 32, 16, 8))
    tn = _pick_tile(n, (512, 256, 128))
    tk = _pick_tile(k, (512, 256, 128))
    grid = (m // tm, n // tn, k // tk)

    return pl.pallas_call(
        fc_matmul_kernel,
        out_shape=jax.ShapeDtypeStruct((m, n), jnp.float32),
        grid_spec=pltpu.PrefetchScalarGridSpec(
            num_scalar_prefetch=0,
            grid=grid,
            in_specs=[
                pl.BlockSpec((tm, tk), lambda i, j, kk: (i, kk)),   # x
                pl.BlockSpec((tn, tk), lambda i, j, kk: (j, kk)),   # W (torch layout)
                pl.BlockSpec((1, tn), lambda i, j, kk: (0, j)),     # bias
            ],
            out_specs=pl.BlockSpec((tm, tn), lambda i, j, kk: (i, j)),
            scratch_shapes=[pltpu.VMEM((tm, tn), jnp.float32)],
        ),
        compiler_params=pltpu.CompilerParams(
            dimension_semantics=("parallel", "parallel", "arbitrary"),
            # Explicit VMEM budget that is safe on v5e/v6e (128 MiB phys) and
            # v7x (64 MiB phys); tiles above are capped well below this.
            vmem_limit_bytes=32 * 1024 * 1024,
        ),
    )(x, w, b)


# ---------------------------------------------------------------------------
# Kernel B: sequential edge updates (vreg-resident) + fused ReLU
# ---------------------------------------------------------------------------
def edge_update_relu_kernel(src_ref, dst_ref, ew_ref, h_ref, o_ref):
    n_edges = src_ref.shape[0]

    h = h_ref[...]                                   # single VMEM load -> vregs
    n_nodes = h.shape[0]
    row_ids = jax.lax.broadcasted_iota(jnp.int32, (n_nodes, 1), 0)

    def body(i, acc):
        s = src_ref[i]                               # scalar int32 from SMEM
        d = dst_ref[i]                               # scalar int32 from SMEM
        w = ew_ref[i]                                # scalar f32 from SMEM
        src_mask = (row_ids == s).astype(jnp.float32)            # [N, 1]
        dst_mask = (row_ids == d).astype(jnp.float32)            # [N, 1]
        row_s = jnp.sum(src_mask * acc, axis=0, keepdims=True)   # [1, F] == acc[s]
        return acc + dst_mask * (w * row_s)          # acc[d] += w * acc[s]

    # Edge order must be preserved (sequential in-place semantics).  Fully
    # unrolled (E is a small compile-time constant) so the LLO scheduler can
    # interleave SMEM scalar reads with the vector work of adjacent edges.
    acc = jax.lax.fori_loop(0, n_edges, body, h, unroll=True)

    # ReLU fused into the single output writeback (lane-dense, F_out % 128 == 0).
    o_ref[...] = jnp.maximum(acc, 0.0)


def _edge_update_relu(src, dst, ew, h):
    smem = pl.BlockSpec(memory_space=pltpu.MemorySpace.SMEM)
    vmem = pl.BlockSpec(memory_space=pltpu.MemorySpace.VMEM)
    return pl.pallas_call(
        edge_update_relu_kernel,
        out_shape=jax.ShapeDtypeStruct(h.shape, h.dtype),
        in_specs=[smem, smem, smem, vmem],
        out_specs=vmem,
        input_output_aliases={3: 0},   # update h in place; no extra HBM copy
    )(src, dst, ew, h)


# ---------------------------------------------------------------------------
# Wrapper (matches GraphConvolutionLayer.forward)
# ---------------------------------------------------------------------------
def graph_convolution_layer(x, edge_index, edge_features, weight, bias):
    """x: [N, C, H, W]; edge_index: [E, 2] (src, dst); edge_features: [E];
    weight: [F_out, F_in] (PyTorch nn.Linear layout); bias: [F_out]."""
    n_nodes = x.shape[0]
    x2 = x.reshape(n_nodes, -1).astype(jnp.float32)        # [N, F_in]
    f_out = weight.shape[0]

    w = jnp.asarray(weight, jnp.float32)                   # [F_out, F_in], no .T copy
    b = jnp.asarray(bias, jnp.float32).reshape(1, f_out)   # [1, F_out]
    src = jnp.asarray(edge_index[:, 0], jnp.int32)         # [E]
    dst = jnp.asarray(edge_index[:, 1], jnp.int32)         # [E]
    ew = jnp.asarray(edge_features, jnp.float32)           # [E]

    h = _fc_projection(x2, w, b)                           # pipelined MXU matmul
    # TODO(synk): for graphs where [N, F_out] exceeds VMEM, the sequential edge
    # pass would need manual HBM row DMA; whole-block residency is used here.
    return _edge_update_relu(src, dst, ew, h)


def reference(x, edge_index, edge_features, weight, bias):
    """Pure numpy replica of the PyTorch forward (sequential in-place loop)."""
    xn = np.asarray(x, np.float32).reshape(x.shape[0], -1)
    h = xn @ np.asarray(weight, np.float32).T + np.asarray(bias, np.float32)
    ei = np.asarray(edge_index)
    ef = np.asarray(edge_features, np.float32)
    for i in range(ei.shape[0]):
        s, d = int(ei[i, 0]), int(ei[i, 1])
        h[d] = h[d] + ef[i] * h[s]
    return np.maximum(h, 0.0)


if __name__ == "__main__":
    key = jax.random.PRNGKey(0)
    k_x, k_w, k_b, k_e, k_ef = jax.random.split(key, 5)

    # small synthetic graph: 8 nodes, node features [4, 8, 4] (NCHW -> F_in=128)
    N, C, H, W = 8, 4, 8, 4
    F_IN = C * H * W            # 128
    F_OUT = 128
    E = 12

    x = jax.random.normal(k_x, (N, C, H, W), dtype=jnp.float32)

    # nn.Linear(in_features, out_features) init: U(-1/sqrt(in), 1/sqrt(in))
    bound = 1.0 / np.sqrt(F_IN)
    weight = jax.random.uniform(k_w, (F_OUT, F_IN), jnp.float32, -bound, bound)
    bias = jax.random.uniform(k_b, (F_OUT,), jnp.float32, -bound, bound)

    edge_index = jax.random.randint(k_e, (E, 2), 0, N, dtype=jnp.int32)
    edge_features = jax.random.uniform(k_ef, (E,), jnp.float32, -0.5, 0.5)

    fwd = jax.jit(graph_convolution_layer)
    out = jax.block_until_ready(fwd(x, edge_index, edge_features, weight, bias))

    ref = reference(np.asarray(x), np.asarray(edge_index),
                    np.asarray(edge_features), np.asarray(weight),
                    np.asarray(bias))
    np.testing.assert_allclose(np.asarray(out), ref, rtol=1e-5, atol=1e-5)

    print("KERNEL_OK")
</pallas_src>

<mosaic_0001>
module attributes {stable_mosaic.version = 11 : i64} {
  func.func @fc_matmul_kernel(%arg0: i32, %arg1: i32, %arg2: i32, %arg3: memref<8x128xf32, #tpu.memory_space<vmem>>, %arg4: memref<128x128xf32, #tpu.memory_space<vmem>>, %arg5: memref<1x128xf32, #tpu.memory_space<vmem>>, %arg6: memref<8x128xf32, #tpu.memory_space<vmem>>, %arg7: memref<8x128xf32, #tpu.memory_space<vmem>>) attributes {dimension_semantics = [#tpu.dimension_semantics<parallel>, #tpu.dimension_semantics<parallel>, #tpu.dimension_semantics<arbitrary>], iteration_bounds = array<i64: 1, 1, 1>, scalar_prefetch = 0 : i64, scratch_operands = 1 : i64, tpu.core_type = #tpu.core_type<tc>, window_params = [{transform_indices = @transform_0, window_bounds = array<i64: 8, 128>}, {transform_indices = @transform_1, window_bounds = array<i64: 128, 128>}, {transform_indices = @transform_2, window_bounds = array<i64: 1, 128>}, {transform_indices = @transform_3, window_bounds = array<i64: 8, 128>}]} {
    %c0_i32 = arith.constant 0 : i32
    %0 = arith.cmpi eq, %arg2, %c0_i32 : i32
    %1 = arith.extui %0 : i1 to i32
    %c0_i32_0 = arith.constant 0 : i32
    %2 = arith.cmpi ne, %1, %c0_i32_0 : i32
    scf.if %2 {
      %cst_10 = arith.constant 0.000000e+00 : f32
      %12 = vector.broadcast %cst_10 : f32 to vector<8x128xf32>
      %c0_11 = arith.constant 0 : index
      %c0_12 = arith.constant 0 : index
      %13 = vector.load %arg7[%c0_11, %c0_12] : memref<8x128xf32, #tpu.memory_space<vmem>>, vector<8x128xf32>
      tpu.vector_store %arg7[%c0_11, %c0_12], %12 {strides = array<i32>} : memref<8x128xf32, #tpu.memory_space<vmem>>, vector<8x128xf32>,
    } else {
    }
    %c0 = arith.constant 0 : index
    %c0_1 = arith.constant 0 : index
    %3 = vector.load %arg7[%c0, %c0_1] : memref<8x128xf32, #tpu.memory_space<vmem>>, vector<8x128xf32>
    %c0_2 = arith.constant 0 : index
    %c0_3 = arith.constant 0 : index
    %4 = vector.load %arg3[%c0_2, %c0_3] : memref<8x128xf32, #tpu.memory_space<vmem>>, vector<8x128xf32>
    %c0_4 = arith.constant 0 : index
    %c0_5 = arith.constant 0 : index
    %5 = vector.load %arg4[%c0_4, %c0_5] : memref<128x128xf32, #tpu.memory_space<vmem>>, vector<128x128xf32>
    %cst = arith.constant dense<0.000000e+00> : vector<8x128xf32>
    %6 = tpu.matmul %4, %5, %cst {dimension_numbers = #tpu.dot_dimension_numbers<[1], [1], [0], [0], [0, 0, 1, 0], [], []>} : vector<8x128xf32>, vector<128x128xf32>, vector<8x128xf32> -> vector<8x128xf32>
    %7 = arith.addf %3, %6 : vector<8x128xf32>
    %c0_6 = arith.constant 0 : index
    %c0_7 = arith.constant 0 : index
    %8 = vector.load %arg7[%c0_6, %c0_7] : memref<8x128xf32, #tpu.memory_space<vmem>>, vector<8x128xf32>
    tpu.vector_store %arg7[%c0_6, %c0_7], %7 {strides = array<i32>} : memref<8x128xf32, #tpu.memory_space<vmem>>, vector<8x128xf32>,
    %c0_i32_8 = arith.constant 0 : i32
    %9 = arith.cmpi eq, %arg2, %c0_i32_8 : i32
    %10 = arith.extui %9 : i1 to i32
    %c0_i32_9 = arith.constant 0 : i32
    %11 = arith.cmpi ne, %10, %c0_i32_9 : i32
    scf.if %11 {
      %c0_10 = arith.constant 0 : index
      %c0_11 = arith.constant 0 : index
      %12 = vector.load %arg7[%c0_10, %c0_11] : memref<8x128xf32, #tpu.memory_space<vmem>>, vector<8x128xf32>
      %c0_12 = arith.constant 0 : index
      %c0_13 = arith.constant 0 : index
      %13 = vector.load %arg5[%c0_12, %c0_13] : memref<1x128xf32, #tpu.memory_space<vmem>>, vector<1x128xf32>
      %14 = vector.broadcast %13 : vector<1x128xf32> to vector<8x128xf32>
      %15 = arith.addf %12, %14 : vector<8x128xf32>
      %c0_14 = arith.constant 0 : index
      %c0_15 = arith.constant 0 : index
      %16 = vector.load %arg6[%c0_14, %c0_15] : memref<8x128xf32, #tpu.memory_space<vmem>>, vector<8x128xf32>
      tpu.vector_store %arg6[%c0_14, %c0_15], %15 {strides = array<i32>} : memref<8x128xf32, #tpu.memory_space<vmem>>, vector<8x128xf32>,
    } else {
    }
    return
  }
  func.func @transform_0(%arg0: i32, %arg1: i32, %arg2: i32) -> (i32, i32) {
    %c0_i32 = arith.constant 0 : i32
    return %arg0, %arg2 : i32, i32
  }
  func.func @transform_1(%arg0: i32, %arg1: i32, %arg2: i32) -> (i32, i32) {
    %c0_i32 = arith.constant 0 : i32
    return %arg1, %arg2 : i32, i32
  }
  func.func @transform_2(%arg0: i32, %arg1: i32, %arg2: i32) -> (i32, i32) {
    %c0_i32 = arith.constant 0 : i32
    %c0_i32_0 = arith.constant 0 : i32
    return %c0_i32, %arg1 : i32, i32
  }
  func.func @transform_3(%arg0: i32, %arg1: i32, %arg2: i32) -> (i32, i32) {
    %c0_i32 = arith.constant 0 : i32
    return %arg0, %arg1 : i32, i32
  }
}

module attributes {stable_mosaic.version = 11 : i64} {
  func.func @edge_update_relu_kernel(%arg0: memref<12xi32, #tpu.memory_space<smem>>, %arg1: memref<12xi32, #tpu.memory_space<smem>>, %arg2: memref<12xf32, #tpu.memory_space<smem>>, %arg3: memref<8x128xf32, #tpu.memory_space<vmem>>, %arg4: memref<8x128xf32, #tpu.memory_space<vmem>>) attributes {dimension_semantics = [], scalar_prefetch = 0 : i64, scratch_operands = 0 : i64, tpu.core_type = #tpu.core_type<tc>} {
    %c0 = arith.constant 0 : index
    %c0_0 = arith.constant 0 : index
    %0 = vector.load %arg3[%c0, %c0_0] : memref<8x128xf32, #tpu.memory_space<vmem>>, vector<8x128xf32>
    %1 = tpu.iota {dimensions = array<i32: 0>} : vector<8x1xi32>
    %c0_i32 = arith.constant 0 : i32
    %2 = arith.index_cast %c0_i32 : i32 to index
    %3 = memref.load %arg0[%2] : memref<12xi32, #tpu.memory_space<smem>>
    %4 = arith.index_cast %c0_i32 : i32 to index
    %5 = memref.load %arg1[%4] : memref<12xi32, #tpu.memory_space<smem>>
    %6 = arith.index_cast %c0_i32 : i32 to index
    %7 = memref.load %arg2[%6] : memref<12xf32, #tpu.memory_space<smem>>
    %8 = vector.broadcast %3 : i32 to vector<8x1xi32>
    %9 = arith.cmpi eq, %1, %8 : vector<8x1xi32>
    %10 = arith.extui %9 : vector<8x1xi1> to vector<8x1xi32>
    %11 = arith.sitofp %10 : vector<8x1xi32> to vector<8x1xf32>
    %12 = vector.broadcast %5 : i32 to vector<8x1xi32>
    %13 = arith.cmpi eq, %1, %12 : vector<8x1xi32>
    %14 = arith.extui %13 : vector<8x1xi1> to vector<8x1xi32>
    %15 = arith.sitofp %14 : vector<8x1xi32> to vector<8x1xf32>
    %16 = vector.broadcast %11 : vector<8x1xf32> to vector<8x128xf32>
    %17 = arith.mulf %16, %0 : vector<8x128xf32>
    %cst = arith.constant dense<0.000000e+00> : vector<128xf32>
    %18 = vector.multi_reduction <add>, %17, %cst [0] : vector<8x128xf32> to vector<128xf32>
    %19 = vector.shape_cast %18 : vector<128xf32> to vector<1x128xf32>
    %20 = vector.broadcast %7 : f32 to vector<1x128xf32>
    %21 = arith.mulf %20, %19 : vector<1x128xf32>
    %22 = vector.broadcast %15 : vector<8x1xf32> to vector<8x128xf32>
    %23 = vector.broadcast %21 : vector<1x128xf32> to vector<8x128xf32>
    %24 = arith.mulf %22, %23 : vector<8x128xf32>
    %25 = arith.addf %0, %24 : vector<8x128xf32>
    %c1_i32 = arith.constant 1 : i32
    %26 = arith.index_cast %c1_i32 : i32 to index
    %27 = memref.load %arg0[%26] : memref<12xi32, #tpu.memory_space<smem>>
    %28 = arith.index_cast %c1_i32 : i32 to index
    %29 = memref.load %arg1[%28] : memref<12xi32, #tpu.memory_space<smem>>
    %30 = arith.index_cast %c1_i32 : i32 to index
    %31 = memref.load %arg2[%30] : memref<12xf32, #tpu.memory_space<smem>>
    %32 = vector.broadcast %27 : i32 to vector<8x1xi32>
    %33 = arith.cmpi eq, %1, %32 : vector<8x1xi32>
    %34 = arith.extui %33 : vector<8x1xi1> to vector<8x1xi32>
    %35 = arith.sitofp %34 : vector<8x1xi32> to vector<8x1xf32>
    %36 = vector.broadcast %29 : i32 to vector<8x1xi32>
    %37 = arith.cmpi eq, %1, %36 : vector<8x1xi32>
    %38 = arith.extui %37 : vector<8x1xi1> to vector<8x1xi32>
    %39 = arith.sitofp %38 : vector<8x1xi32> to vector<8x1xf32>
    %40 = vector.broadcast %35 : vector<8x1xf32> to vector<8x128xf32>
    %41 = arith.mulf %40, %25 : vector<8x128xf32>
    %cst_1 = arith.constant dense<0.000000e+00> : vector<128xf32>
    %42 = vector.multi_reduction <add>, %41, %cst_1 [0] : vector<8x128xf32> to vector<128xf32>
    %43 = vector.shape_cast %42 : vector<128xf32> to vector<1x128xf32>
    %44 = vector.broadcast %31 : f32 to vector<1x128xf32>
    %45 = arith.mulf %44, %43 : vector<1x128xf32>
    %46 = vector.broadcast %39 : vector<8x1xf32> to vector<8x128xf32>
    %47 = vector.broadcast %45 : vector<1x128xf32> to vector<8x128xf32>
    %48 = arith.mulf %46, %47 : vector<8x128xf32>
    %49 = arith.addf %25, %48 : vector<8x128xf32>
    %c2_i32 = arith.constant 2 : i32
    %50 = arith.index_cast %c2_i32 : i32 to index
    %51 = memref.load %arg0[%50] : memref<12xi32, #tpu.memory_space<smem>>
    %52 = arith.index_cast %c2_i32 : i32 to index
    %53 = memref.load %arg1[%52] : memref<12xi32, #tpu.memory_space<smem>>
    %54 = arith.index_cast %c2_i32 : i32 to index
    %55 = memref.load %arg2[%54] : memref<12xf32, #tpu.memory_space<smem>>
    %56 = vector.broadcast %51 : i32 to vector<8x1xi32>
    %57 = arith.cmpi eq, %1, %56 : vector<8x1xi32>
    %58 = arith.extui %57 : vector<8x1xi1> to vector<8x1xi32>
    %59 = arith.sitofp %58 : vector<8x1xi32> to vector<8x1xf32>
    %60 = vector.broadcast %53 : i32 to vector<8x1xi32>
    %61 = arith.cmpi eq, %1, %60 : vector<8x1xi32>
    %62 = arith.extui %61 : vector<8x1xi1> to vector<8x1xi32>
    %63 = arith.sitofp %62 : vector<8x1xi32> to vector<8x1xf32>
    %64 = vector.broadcast %59 : vector<8x1xf32> to vector<8x128xf32>
    %65 = arith.mulf %64, %49 : vector<8x128xf32>
    %cst_2 = arith.constant dense<0.000000e+00> : vector<128xf32>
    %66 = vector.multi_reduction <add>, %65, %cst_2 [0] : vector<8x128xf32> to vector<128xf32>
    %67 = vector.shape_cast %66 : vector<128xf32> to vector<1x128xf32>
    %68 = vector.broadcast %55 : f32 to vector<1x128xf32>
    %69 = arith.mulf %68, %67 : vector<1x128xf32>
    %70 = vector.broadcast %63 : vector<8x1xf32> to vector<8x128xf32>
    %71 = vector.broadcast %69 : vector<1x128xf32> to vector<8x128xf32>
    %72 = arith.mulf %70, %71 : vector<8x128xf32>
    %73 = arith.addf %49, %72 : vector<8x128xf32>
    %c3_i32 = arith.constant 3 : i32
    %74 = arith.index_cast %c3_i32 : i32 to index
    %75 = memref.load %arg0[%74] : memref<12xi32, #tpu.memory_space<smem>>
    %76 = arith.index_cast %c3_i32 : i32 to index
    %77 = memref.load %arg1[%76] : memref<12xi32, #tpu.memory_space<smem>>
    %78 = arith.index_cast %c3_i32 : i32 to index
    %79 = memref.load %arg2[%78] : memref<12xf32, #tpu.memory_space<smem>>
    %80 = vector.broadcast %75 : i32 to vector<8x1xi32>
    %81 = arith.cmpi eq, %1, %80 : vector<8x1xi32>
    %82 = arith.extui %81 : vector<8x1xi1> to vector<8x1xi32>
    %83 = arith.sitofp %82 : vector<8x1xi32> to vector<8x1xf32>
    %84 = vector.broadcast %77 : i32 to vector<8x1xi32>
    %85 = arith.cmpi eq, %1, %84 : vector<8x1xi32>
    %86 = arith.extui %85 : vector<8x1xi1> to vector<8x1xi32>
    %87 = arith.sitofp %86 : vector<8x1xi32> to vector<8x1xf32>
    %88 = vector.broadcast %83 : vector<8x1xf32> to vector<8x128xf32>
    %89 = arith.mulf %88, %73 : vector<8x128xf32>
    %cst_3 = arith.constant dense<0.000000e+00> : vector<128xf32>
    %90 = vector.multi_reduction <add>, %89, %cst_3 [0] : vector<8x128xf32> to vector<128xf32>
    %91 = vector.shape_cast %90 : vector<128xf32> to vector<1x128xf32>
    %92 = vector.broadcast %79 : f32 to vector<1x128xf32>
    %93 = arith.mulf %92, %91 : vector<1x128xf32>
    %94 = vector.broadcast %87 : vector<8x1xf32> to vector<8x128xf32>
    %95 = vector.broadcast %93 : vector<1x128xf32> to vector<8x128xf32>
    %96 = arith.mulf %94, %95 : vector<8x128xf32>
    %97 = arith.addf %73, %96 : vector<8x128xf32>
    %c4_i32 = arith.constant 4 : i32
    %98 = arith.index_cast %c4_i32 : i32 to index
    %99 = memref.load %arg0[%98] : memref<12xi32, #tpu.memory_space<smem>>
    %100 = arith.index_cast %c4_i32 : i32 to index
    %101 = memref.load %arg1[%100] : memref<12xi32, #tpu.memory_space<smem>>
    %102 = arith.index_cast %c4_i32 : i32 to index
    %103 = memref.load %arg2[%102] : memref<12xf32, #tpu.memory_space<smem>>
    %104 = vector.broadcast %99 : i32 to vector<8x1xi32>
    %105 = arith.cmpi eq, %1, %104 : vector<8x1xi32>
    %106 = arith.extui %105 : vector<8x1xi1> to vector<8x1xi32>
    %107 = arith.sitofp %106 : vector<8x1xi32> to vector<8x1xf32>
    %108 = vector.broadcast %101 : i32 to vector<8x1xi32>
    %109 = arith.cmpi eq, %1, %108 : vector<8x1xi32>
    %110 = arith.extui %109 : vector<8x1xi1> to vector<8x1xi32>
    %111 = arith.sitofp %110 : vector<8x1xi32> to vector<8x1xf32>
    %112 = vector.broadcast %107 : vector<8x1xf32> to vector<8x128xf32>
    %113 = arith.mulf %112, %97 : vector<8x128xf32>
    %cst_4 = arith.constant dense<0.000000e+00> : vector<128xf32>
    %114 = vector.multi_reduction <add>, %113, %cst_4 [0] : vector<8x128xf32> to vector<128xf32>
    %115 = vector.shape_cast %114 : vector<128xf32> to vector<1x128xf32>
    %116 = vector.broadcast %103 : f32 to vector<1x128xf32>
    %117 = arith.mulf %116, %115 : vector<1x128xf32>
    %118 = vector.broadcast %111 : vector<8x1xf32> to vector<8x128xf32>
    %119 = vector.broadcast %117 : vector<1x128xf32> to vector<8x128xf32>
    %120 = arith.mulf %118, %119 : vector<8x128xf32>
    %121 = arith.addf %97, %120 : vector<8x128xf32>
    %c5_i32 = arith.constant 5 : i32
    %122 = arith.index_cast %c5_i32 : i32 to index
    %123 = memref.load %arg0[%122] : memref<12xi32, #tpu.memory_space<smem>>
    %124 = arith.index_cast %c5_i32 : i32 to index
    %125 = memref.load %arg1[%124] : memref<12xi32, #tpu.memory_space<smem>>
    %126 = arith.index_cast %c5_i32 : i32 to index
    %127 = memref.load %arg2[%126] : memref<12xf32, #tpu.memory_space<smem>>
    %128 = vector.broadcast %123 : i32 to vector<8x1xi32>
    %129 = arith.cmpi eq, %1, %128 : vector<8x1xi32>
    %130 = arith.extui %129 : vector<8x1xi1> to vector<8x1xi32>
    %131 = arith.sitofp %130 : vector<8x1xi32> to vector<8x1xf32>
    %132 = vector.broadcast %125 : i32 to vector<8x1xi32>
    %133 = arith.cmpi eq, %1, %132 : vector<8x1xi32>
    %134 = arith.extui %133 : vector<8x1xi1> to vector<8x1xi32>
    %135 = arith.sitofp %134 : vector<8x1xi32> to vector<8x1xf32>
    %136 = vector.broadcast %131 : vector<8x1xf32> to vector<8x128xf32>
    %137 = arith.mulf %136, %121 : vector<8x128xf32>
    %cst_5 = arith.constant dense<0.000000e+00> : vector<128xf32>
    %138 = vector.multi_reduction <add>, %137, %cst_5 [0] : vector<8x128xf32> to vector<128xf32>
    %139 = vector.shape_cast %138 : vector<128xf32> to vector<1x128xf32>
    %140 = vector.broadcast %127 : f32 to vector<1x128xf32>
    %141 = arith.mulf %140, %139 : vector<1x128xf32>
    %142 = vector.broadcast %135 : vector<8x1xf32> to vector<8x128xf32>
    %143 = vector.broadcast %141 : vector<1x128xf32> to vector<8x128xf32>
    %144 = arith.mulf %142, %143 : vector<8x128xf32>
    %145 = arith.addf %121, %144 : vector<8x128xf32>
    %c6_i32 = arith.constant 6 : i32
    %146 = arith.index_cast %c6_i32 : i32 to index
    %147 = memref.load %arg0[%146] : memref<12xi32, #tpu.memory_space<smem>>
    %148 = arith.index_cast %c6_i32 : i32 to index
    %149 = memref.load %arg1[%148] : memref<12xi32, #tpu.memory_space<smem>>
    %150 = arith.index_cast %c6_i32 : i32 to index
    %151 = memref.load %arg2[%150] : memref<12xf32, #tpu.memory_space<smem>>
    %152 = vector.broadcast %147 : i32 to vector<8x1xi32>
    %153 = arith.cmpi eq, %1, %152 : vector<8x1xi32>
    %154 = arith.extui %153 : vector<8x1xi1> to vector<8x1xi32>
    %155 = arith.sitofp %154 : vector<8x1xi32> to vector<8x1xf32>
    %156 = vector.broadcast %149 : i32 to vector<8x1xi32>
    %157 = arith.cmpi eq, %1, %156 : vector<8x1xi32>
    %158 = arith.extui %157 : vector<8x1xi1> to vector<8x1xi32>
    %159 = arith.sitofp %158 : vector<8x1xi32> to vector<8x1xf32>
    %160 = vector.broadcast %155 : vector<8x1xf32> to vector<8x128xf32>
    %161 = arith.mulf %160, %145 : vector<8x128xf32>
    %cst_6 = arith.constant dense<0.000000e+00> : vector<128xf32>
    %162 = vector.multi_reduction <add>, %161, %cst_6 [0] : vector<8x128xf32> to vector<128xf32>
    %163 = vector.shape_cast %162 : vector<128xf32> to vector<1x128xf32>
    %164 = vector.broadcast %151 : f32 to vector<1x128xf32>
    %165 = arith.mulf %164, %163 : vector<1x128xf32>
    %166 = vector.broadcast %159 : vector<8x1xf32> to vector<8x128xf32>
    %167 = vector.broadcast %165 : vector<1x128xf32> to vector<8x128xf32>
    %168 = arith.mulf %166, %167 : vector<8x128xf32>
    %169 = arith.addf %145, %168 : vector<8x128xf32>
    %c7_i32 = arith.constant 7 : i32
    %170 = arith.index_cast %c7_i32 : i32 to index
    %171 = memref.load %arg0[%170] : memref<12xi32, #tpu.memory_space<smem>>
    %172 = arith.index_cast %c7_i32 : i32 to index
    %173 = memref.load %arg1[%172] : memref<12xi32, #tpu.memory_space<smem>>
    %174 = arith.index_cast %c7_i32 : i32 to index
    %175 = memref.load %arg2[%174] : memref<12xf32, #tpu.memory_space<smem>>
    %176 = vector.broadcast %171 : i32 to vector<8x1xi32>
    %177 = arith.cmpi eq, %1, %176 : vector<8x1xi32>
    %178 = arith.extui %177 : vector<8x1xi1> to vector<8x1xi32>
    %179 = arith.sitofp %178 : vector<8x1xi32> to vector<8x1xf32>
    %180 = vector.broadcast %173 : i32 to vector<8x1xi32>
    %181 = arith.cmpi eq, %1, %180 : vector<8x1xi32>
    %182 = arith.extui %181 : vector<8x1xi1> to vector<8x1xi32>
    %183 = arith.sitofp %182 : vector<8x1xi32> to vector<8x1xf32>
    %184 = vector.broadcast %179 : vector<8x1xf32> to vector<8x128xf32>
    %185 = arith.mulf %184, %169 : vector<8x128xf32>
    %cst_7 = arith.constant dense<0.000000e+00> : vector<128xf32>
    %186 = vector.multi_reduction <add>, %185, %cst_7 [0] : vector<8x128xf32> to vector<128xf32>
    %187 = vector.shape_cast %186 : vector<128xf32> to vector<1x128xf32>
    %188 = vector.broadcast %175 : f32 to vector<1x128xf32>
    %189 = arith.mulf %188, %187 : vector<1x128xf32>
    %190 = vector.broadcast %183 : vector<8x1xf32> to vector<8x128xf32>
    %191 = vector.broadcast %189 : vector<1x128xf32> to vector<8x128xf32>
    %192 = arith.mulf %190, %191 : vector<8x128xf32>
    %193 = arith.addf %169, %192 : vector<8x128xf32>
    %c8_i32 = arith.constant 8 : i32
    %194 = arith.index_cast %c8_i32 : i32 to index
    %195 = memref.load %arg0[%194] : memref<12xi32, #tpu.memory_space<smem>>
    %196 = arith.index_cast %c8_i32 : i32 to index
    %197 = memref.load %arg1[%196] : memref<12xi32, #tpu.memory_space<smem>>
    %198 = arith.index_cast %c8_i32 : i32 to index
    %199 = memref.load %arg2[%198] : memref<12xf32, #tpu.memory_space<smem>>
    %200 = vector.broadcast %195 : i32 to vector<8x1xi32>
    %201 = arith.cmpi eq, %1, %200 : vector<8x1xi32>
    %202 = arith.extui %201 : vector<8x1xi1> to vector<8x1xi32>
    %203 = arith.sitofp %202 : vector<8x1xi32> to vector<8x1xf32>
    %204 = vector.broadcast %197 : i32 to vector<8x1xi32>
    %205 = arith.cmpi eq, %1, %204 : vector<8x1xi32>
    %206 = arith.extui %205 : vector<8x1xi1> to vector<8x1xi32>
    %207 = arith.sitofp %206 : vector<8x1xi32> to vector<8x1xf32>
    %208 = vector.broadcast %203 : vector<8x1xf32> to vector<8x128xf32>
    %209 = arith.mulf %208, %193 : vector<8x128xf32>
    %cst_8 = arith.constant dense<0.000000e+00> : vector<128xf32>
    %210 = vector.multi_reduction <add>, %209, %cst_8 [0] : vector<8x128xf32> to vector<128xf32>
    %211 = vector.shape_cast %210 : vector<128xf32> to vector<1x128xf32>
    %212 = vector.broadcast %199 : f32 to vector<1x128xf32>
    %213 = arith.mulf %212, %211 : vector<1x128xf32>
    %214 = vector.broadcast %207 : vector<8x1xf32> to vector<8x128xf32>
    %215 = vector.broadcast %213 : vector<1x128xf32> to vector<8x128xf32>
    %216 = arith.mulf %214, %215 : vector<8x128xf32>
    %217 = arith.addf %193, %216 : vector<8x128xf32>
    %c9_i32 = arith.constant 9 : i32
    %218 = arith.index_cast %c9_i32 : i32 to index
    %219 = memref.load %arg0[%218] : memref<12xi32, #tpu.memory_space<smem>>
    %220 = arith.index_cast %c9_i32 : i32 to index
    %221 = memref.load %arg1[%220] : memref<12xi32, #tpu.memory_space<smem>>
    %222 = arith.index_cast %c9_i32 : i32 to index
    %223 = memref.load %arg2[%222] : memref<12xf32, #tpu.memory_space<smem>>
    %224 = vector.broadcast %219 : i32 to vector<8x1xi32>
    %225 = arith.cmpi eq, %1, %224 : vector<8x1xi32>
    %226 = arith.extui %225 : vector<8x1xi1> to vector<8x1xi32>
    %227 = arith.sitofp %226 : vector<8x1xi32> to vector<8x1xf32>
    %228 = vector.broadcast %221 : i32 to vector<8x1xi32>
    %229 = arith.cmpi eq, %1, %228 : vector<8x1xi32>
    %230 = arith.extui %229 : vector<8x1xi1> to vector<8x1xi32>
    %231 = arith.sitofp %230 : vector<8x1xi32> to vector<8x1xf32>
    %232 = vector.broadcast %227 : vector<8x1xf32> to vector<8x128xf32>
    %233 = arith.mulf %232, %217 : vector<8x128xf32>
    %cst_9 = arith.constant dense<0.000000e+00> : vector<128xf32>
    %234 = vector.multi_reduction <add>, %233, %cst_9 [0] : vector<8x128xf32> to vector<128xf32>
    %235 = vector.shape_cast %234 : vector<128xf32> to vector<1x128xf32>
    %236 = vector.broadcast %223 : f32 to vector<1x128xf32>
    %237 = arith.mulf %236, %235 : vector<1x128xf32>
    %238 = vector.broadcast %231 : vector<8x1xf32> to vector<8x128xf32>
    %239 = vector.broadcast %237 : vector<1x128xf32> to vector<8x128xf32>
    %240 = arith.mulf %238, %239 : vector<8x128xf32>
    %241 = arith.addf %217, %240 : vector<8x128xf32>
    %c10_i32 = arith.constant 10 : i32
    %242 = arith.index_cast %c10_i32 : i32 to index
    %243 = memref.load %arg0[%242] : memref<12xi32, #tpu.memory_space<smem>>
    %244 = arith.index_cast %c10_i32 : i32 to index
    %245 = memref.load %arg1[%244] : memref<12xi32, #tpu.memory_space<smem>>
    %246 = arith.index_cast %c10_i32 : i32 to index
    %247 = memref.load %arg2[%246] : memref<12xf32, #tpu.memory_space<smem>>
    %248 = vector.broadcast %243 : i32 to vector<8x1xi32>
    %249 = arith.cmpi eq, %1, %248 : vector<8x1xi32>
    %250 = arith.extui %249 : vector<8x1xi1> to vector<8x1xi32>
    %251 = arith.sitofp %250 : vector<8x1xi32> to vector<8x1xf32>
    %252 = vector.broadcast %245 : i32 to vector<8x1xi32>
    %253 = arith.cmpi eq, %1, %252 : vector<8x1xi32>
    %254 = arith.extui %253 : vector<8x1xi1> to vector<8x1xi32>
    %255 = arith.sitofp %254 : vector<8x1xi32> to vector<8x1xf32>
    %256 = vector.broadcast %251 : vector<8x1xf32> to vector<8x128xf32>
    %257 = arith.mulf %256, %241 : vector<8x128xf32>
    %cst_10 = arith.constant dense<0.000000e+00> : vector<128xf32>
    %258 = vector.multi_reduction <add>, %257, %cst_10 [0] : vector<8x128xf32> to vector<128xf32>
    %259 = vector.shape_cast %258 : vector<128xf32> to vector<1x128xf32>
    %260 = vector.broadcast %247 : f32 to vector<1x128xf32>
    %261 = arith.mulf %260, %259 : vector<1x128xf32>
    %262 = vector.broadcast %255 : vector<8x1xf32> to vector<8x128xf32>
    %263 = vector.broadcast %261 : vector<1x128xf32> to vector<8x128xf32>
    %264 = arith.mulf %262, %263 : vector<8x128xf32>
    %265 = arith.addf %241, %264 : vector<8x128xf32>
    %c11_i32 = arith.constant 11 : i32
    %266 = arith.index_cast %c11_i32 : i32 to index
    %267 = memref.load %arg0[%266] : memref<12xi32, #tpu.memory_space<smem>>
    %268 = arith.index_cast %c11_i32 : i32 to index
    %269 = memref.load %arg1[%268] : memref<12xi32, #tpu.memory_space<smem>>
    %270 = arith.index_cast %c11_i32 : i32 to index
    %271 = memref.load %arg2[%270] : memref<12xf32, #tpu.memory_space<smem>>
    %272 = vector.broadcast %267 : i32 to vector<8x1xi32>
    %273 = arith.cmpi eq, %1, %272 : vector<8x1xi32>
    %274 = arith.extui %273 : vector<8x1xi1> to vector<8x1xi32>
    %275 = arith.sitofp %274 : vector<8x1xi32> to vector<8x1xf32>
    %276 = vector.broadcast %269 : i32 to vector<8x1xi32>
    %277 = arith.cmpi eq, %1, %276 : vector<8x1xi32>
    %278 = arith.extui %277 : vector<8x1xi1> to vector<8x1xi32>
    %279 = arith.sitofp %278 : vector<8x1xi32> to vector<8x1xf32>
    %280 = vector.broadcast %275 : vector<8x1xf32> to vector<8x128xf32>
    %281 = arith.mulf %280, %265 : vector<8x128xf32>
    %cst_11 = arith.constant dense<0.000000e+00> : vector<128xf32>
    %282 = vector.multi_reduction <add>, %281, %cst_11 [0] : vector<8x128xf32> to vector<128xf32>
    %283 = vector.shape_cast %282 : vector<128xf32> to vector<1x128xf32>
    %284 = vector.broadcast %271 : f32 to vector<1x128xf32>
    %285 = arith.mulf %284, %283 : vector<1x128xf32>
    %286 = vector.broadcast %279 : vector<8x1xf32> to vector<8x128xf32>
    %287 = vector.broadcast %285 : vector<1x128xf32> to vector<8x128xf32>
    %288 = arith.mulf %286, %287 : vector<8x128xf32>
    %289 = arith.addf %265, %288 : vector<8x128xf32>
    %c12_i32 = arith.constant 12 : i32
    %cst_12 = arith.constant 0.000000e+00 : f32
    %290 = vector.broadcast %cst_12 : f32 to vector<8x128xf32>
    %291 = arith.maximumf %289, %290 : vector<8x128xf32>
    %c0_13 = arith.constant 0 : index
    %c0_14 = arith.constant 0 : index
    %292 = vector.load %arg4[%c0_13, %c0_14] : memref<8x128xf32, #tpu.memory_space<vmem>>, vector<8x128xf32>
    tpu.vector_store %arg4[%c0_13, %c0_14], %291 {strides = array<i32>} : memref<8x128xf32, #tpu.memory_space<vmem>>, vector<8x128xf32>,
    return
  }
}

</mosaic_0001>

<bundles_post_ra>
// kernel: graph_convolution_layer.3
= control target key start
LH: loop header
LB: loop body
LE: loop exit
PB: predicated region body
PF: predicated region fallthrough
CT: control target
= control target key end

     0   :  { %9 = vsyncpa [#allocation5], 0  ;;  %s595_s0 = inlined_call_operand.vmem [shape: s32[12], index: 0, kind: input, shape index: {}]   ;;  %s596_s1 = inlined_call_operand.vmem [shape: s32[12], index: 1, kind: input, shape index: {}]   ;;  %s597_s2 = inlined_call_operand.vmem [shape: f32[12], index: 2, kind: input, shape index: {}]   ;;  %s598_s3 = inlined_call_operand.hbm [shape: f32[8,128], index: 3, kind: input, shape index: {}, may-alias: {3,4}]   ;;  %s599_s4 = inlined_call_operand.hbm [shape: f32[8,128], index: 4, kind: output, shape index: {}, may-alias: {3,4}]  }
   0x1   :  { %10 = vsyncpa [#allocation7], 0 }
   0x2   :  { %11 = vsyncpa [#allocation3], 0  ;;  %s29_s17 = sshll.u32 %s596_s1, 4  ;;  %s30_s17 = int_to_ptr.vmem [resolvable:$true] %s29_s17 }
   0x3   :  { %12 = vsyncpa [#allocation4], 0  ;;  %s19_s20 = sshll.u32 %s595_s0, 4  ;;  %s415_s21 = scalar_lea.vmem %s30_s17, 16  ;;  %s20_s20 = int_to_ptr.vmem [resolvable:$true] %s19_s20 }
   0x4   :  { %p416_p0 = scmp.ne.s32.totalorder %s30_s17, %s415_s21  ;;  %p420_p1 = scmp.lt.s32.totalorder %s30_s17, %s30_s17 }
   0x5   :  { %p421_p2 = scmp.lt.s32.totalorder %s415_s21, %s415_s21 }
   0x7   :  { %p422_p3 = por %p421_p2, %p420_p1 }
   0x9   :  { %p423_p4 = pnand %p422_p3, %p416_p0 }
   0xb   :  { %426 = shalt.err (!%p423_p4)
}
   0xc   :  { %s499_s22 = smov [#allocation6]   ;;  %s427_s23 = scalar_lea.vmem %s20_s20, 16 }
   0xd   :  { %32 = dma.vmem_to_smem %s30_s17, 16, %s499_s22, [#allocation7]  }
   0xe   :  { %p428_p5 = scmp.ne.s32.totalorder %s20_s20, %s427_s23  ;;  %p432_p6 = scmp.lt.s32.totalorder %s20_s20, %s20_s20 }
   0xf   :  { %p433_p7 = scmp.lt.s32.totalorder %s427_s23, %s427_s23 }
  0x11   :  { %p434_p8 = por %p433_p7, %p432_p6 }
  0x13   :  { %p435_p9 = pnand %p434_p8, %p428_p5 }
  0x15   :  { %438 = shalt.err (!%p435_p9)
}
  0x16   :  { %s500_s1 = smov [#allocation2]   ;;  %s39_s25 = sshll.u32 %s597_s2, 4  ;;  %s40_s25 = int_to_ptr.vmem [resolvable:$true] %s39_s25 }
  0x17   :  { %22 = dma.vmem_to_smem %s20_s20, 16, %s500_s1, [#allocation5]  }
  0x18   :  { %s439_s26 = scalar_lea.vmem %s40_s25, 16  ;;  %p444_p11 = scmp.lt.s32.totalorder %s40_s25, %s40_s25 }
  0x19   :  { %p440_p10 = scmp.ne.s32.totalorder %s40_s25, %s439_s26  ;;  %p445_p12 = scmp.lt.s32.totalorder %s439_s26, %s439_s26 }
  0x1b   :  { %p446_p13 = por %p445_p12, %p444_p11 }
  0x1d   :  { %p447_p0 = pnand %p446_p13, %p440_p10 }
  0x1f   :  { %450 = shalt.err (!%p447_p0)
}
  0x20   :  { %s501_s27 = smov [#allocation8]   ;;  %s502_s28 = smov [#allocation9]  }
  0x21   :  { %42 = dma.vmem_to_smem %s40_s25, 16, %s501_s27, [#allocation7]  }
  0x22   :  { %s49_s29 = sshll.u32 %s502_s28, 4  ;;  %s50_s29 = int_to_ptr.vmem [resolvable:$true] %s49_s29 }
  0x23   :  { %s459_s30 = scalar_lea.vmem %s50_s29, 128  ;;  %p464_p2 = scmp.lt.s32.totalorder %s50_s29, %s50_s29 }
  0x24   :  { %p460_p1 = scmp.ne.s32.totalorder %s50_s29, %s459_s30  ;;  %p465_p3 = scmp.lt.s32.totalorder %s459_s30, %s459_s30 }
  0x26   :  { %p466_p4 = por %p465_p3, %p464_p2 }
  0x28   :  { %p467_p5 = pnand %p466_p4, %p460_p1 }
  0x2a   :  { %470 = shalt.err (!%p467_p5)
}
  0x2b   :  { %52 = dma.hbm_to_vmem [thread:$0]  %s598_s3, 128, %s50_s29, [#allocation3]  }
  0x2c   :  { %491 = dma.done.wait [#allocation5], 16  }
  0x2d   :  { %492 = vsyncadd [#allocation5], 4294967280 }
  0x2e   :  { %493 = dma.done.wait [#allocation7], 32  }
  0x2f   :  { %494 = vsyncadd [#allocation7], 4294967264 }
  0x30   :  { %495 = dma.done.wait [#allocation3], 128  }
  0x31   :  { %496 = vsyncadd [#allocation3], 4294967168 }
  0x32   :  { %65 = sfence }
  0x33   :  { %v67_v0 = vlaneseq  ;;  %s69_s6 = sld [smem:[#allocation2]]  ;;  %v66_v2 = vld [vmem:[#allocation9] sm:$0xff]  ;;  %v503_v4 = vmov 0.0  }
  0x34   :  { %s70_s7 = sld [smem:[#allocation6]] }
  0x35   :  { %v542_v1 = vshrl.u32 %v67_v0, 7  ;;  %s71_s3 = sld [smem:[#allocation8]] }
  0x36   :  { %s354_s8 = sld [smem:[#allocation2 + $0x1]] }
  0x37   :  { %s355_s9 = sld [smem:[#allocation6 + $0x1]] }
  0x38   :  { %s356_s10 = sld [smem:[#allocation8 + $0x1]] }
  0x39   :  { %v72_v3 = vstv %s69_s6  ;;  %s359_s11 = sld [smem:[#allocation2 + $0x2]] }
  0x3a   :  { %vm73_vm0 = vcmp.eq.s32.totalorder %v542_v1, %v72_v3  ;;  %v76_v10 = vstv %s70_s7  ;;  %s360_s12 = sld [smem:[#allocation6 + $0x2]] }
  0x3b   :  { %v352_v5 = vsel %vm73_vm0, 1.0, %v503_v4  ;;  %vm77_vm1 = vcmp.eq.s32.totalorder %v542_v1, %v76_v10  ;;  %v87_v13 = vstv %s71_s3  ;;  %s361_s13 = sld [smem:[#allocation8 + $0x2]] }
  0x3c   :  { %v80_v6 = vmul.f32 %v352_v5, %v66_v2  ;;  %v94_v14 = vstv %s354_s8  ;;  %v353_v16 = vsel %vm77_vm1, 1.0, %v503_v4  ;;  %s364_s14 = sld [smem:[#allocation2 + $0x3]] }
  0x3d   :  { %vm95_vm2 = vcmp.eq.s32.totalorder %v542_v1, %v94_v14  ;;  %v98_v25 = vstv %s355_s9  ;;  %s365_s15 = sld [smem:[#allocation6 + $0x3]] }
  0x3e   :  { %v81_v7 = vrot.slane %v80_v6, 4  ;;  %v357_v19 = vsel %vm95_vm2, 1.0, %v503_v4  ;;  %vm99_vm3 = vcmp.eq.s32.totalorder %v542_v1, %v98_v25  ;;  %v109_v28 = vstv %s356_s10  ;;  %s366_s16 = sld [smem:[#allocation8 + $0x3]] }
  0x3f   :  { %v116_v29 = vstv %s359_s11  ;;  %v358_v31 = vsel %vm99_vm3, 1.0, %v503_v4  ;;  %s369_s17 = sld [smem:[#allocation2 + $0x4]]  ;;  %s504_s11 = smov [#allocation10]  }
  0x40   :  { %v82_v8 = vadd.f32 %v81_v7, %v80_v6  ;;  %vm117_vm4 = vcmp.eq.s32.totalorder %v542_v1, %v116_v29  ;;  %v120_v40 = vstv %s360_s12  ;;  %s370_s18 = sld [smem:[#allocation6 + $0x4]]  ;;  %s341_s12 = sshll.u32 %s504_s11, 4  ;;  %s342_s12 = int_to_ptr.vmem [resolvable:$true] %s341_s12 }
  0x41   :  { %v362_v34 = vsel %vm117_vm4, 1.0, %v503_v4  ;;  %vm121_vm5 = vcmp.eq.s32.totalorder %v542_v1, %v120_v40  ;;  %v131_v43 = vstv %s361_s13  ;;  %s371_s19 = sld [smem:[#allocation8 + $0x4]]  ;;  %s471_s13 = scalar_lea.vmem %s342_s12, 128 }
  0x42   :  { %v83_v9 = vrot.slane %v82_v8, 2  ;;  %v138_v44 = vstv %s364_s14  ;;  %v363_v46 = vsel %vm121_vm5, 1.0, %v503_v4  ;;  %s374_s20 = sld [smem:[#allocation2 + $0x5]]  ;;  %p472_p6 = scmp.ne.s32.totalorder %s342_s12, %s471_s13 }
  0x43   :  { %vm139_vm6 = vcmp.eq.s32.totalorder %v542_v1, %v138_v44  ;;  %v142_v55 = vstv %s365_s15  ;;  %s375_s21 = sld [smem:[#allocation6 + $0x5]]  ;;  %p476_p7 = scmp.lt.s32.totalorder %s342_s12, %s342_s12 }
  0x44   :  { %v84_v11 = vadd.f32 %v83_v9, %v82_v8  ;;  %v367_v49 = vsel %vm139_vm6, 1.0, %v503_v4  ;;  %vm143_vm7 = vcmp.eq.s32.totalorder %v542_v1, %v142_v55  ;;  %v153_v58 = vstv %s366_s16  ;;  %s376_s22 = sld [smem:[#allocation8 + $0x5]]  ;;  %p477_p8 = scmp.lt.s32.totalorder %s471_s13, %s471_s13 }
  0x45   :  { %v160_v59 = vstv %s369_s17  ;;  %v368_v61 = vsel %vm143_vm7, 1.0, %v503_v4  ;;  %s379_s23 = sld [smem:[#allocation2 + $0x6]] }
  0x46   :  { %v85_v12 = vrot.slane %v84_v11, 1  ;;  %vm161_vm8 = vcmp.eq.s32.totalorder %v542_v1, %v160_v59  ;;  %v164_v8 = vstv %s370_s18  ;;  %s380_s1 = sld [smem:[#allocation6 + $0x6]]  ;;  %p478_p9 = por %p477_p8, %p476_p7 }
  0x47   :  { %v372_v0 = vsel %vm161_vm8, 1.0, %v503_v4  ;;  %vm165_vm9 = vcmp.eq.s32.totalorder %v542_v1, %v164_v8  ;;  %s381_s0 = sld [smem:[#allocation8 + $0x6]] }
  0x48   :  { %v86_v15 = vadd.f32 %v85_v12, %v84_v11  ;;  %v175_v11 = vstv %s371_s19  ;;  %v182_v12 = vstv %s374_s20  ;;  %v373_v14 = vsel %vm165_vm9, 1.0, %v503_v4  ;;  %s384_s24 = sld [smem:[#allocation2 + $0x7]]  ;;  %p479_p10 = pnand %p478_p9, %p472_p6 }
  0x49   :  { %vm183_vm10 = vcmp.eq.s32.totalorder %v542_v1, %v182_v12  ;;  %s385_s25 = sld [smem:[#allocation6 + $0x7]] }
  0x4a   :  { %v88_v17 = vmul.f32 %v87_v13, %v86_v15  ;;  %s386_s26 = sld [smem:[#allocation8 + $0x7]] }
  0x4b   :  { %s389_s27 = sld [smem:[#allocation2 + $0x8]] }
  0x4c   :  { %v89_v18 = vmul.f32 %v353_v16, %v88_v17  ;;  %v377_v17 = vsel %vm183_vm10, 1.0, %v503_v4  ;;  %s390_s28 = sld [smem:[#allocation6 + $0x8]] }
  0x4d   :  { %s391_s29 = sld [smem:[#allocation8 + $0x8]] }
  0x4e   :  { %v90_v20 = vadd.f32 %v89_v18, %v66_v2  ;;  %s394_s30 = sld [smem:[#allocation2 + $0x9]] }
  0x4f   :  { %s395_s2 = sld [smem:[#allocation6 + $0x9]] }
  0x50   :  { %v102_v21 = vmul.f32 %v357_v19, %v90_v20  ;;  %s396_s5 = sld [smem:[#allocation8 + $0x9]] }
  0x51   :  { %s399_s6 = sld [smem:[#allocation2 + $0xa]] }
  0x52   :  { %v103_v22 = vrot.slane %v102_v21, 4  ;;  %s400_s7 = sld [smem:[#allocation6 + $0xa]] }
  0x53   :  { %s401_s3 = sld [smem:[#allocation8 + $0xa]] }
  0x54   :  { %v104_v23 = vadd.f32 %v103_v22, %v102_v21  ;;  %s404_s8 = sld [smem:[#allocation2 + $0xb]] }
  0x55   :  { %s405_s9 = sld [smem:[#allocation6 + $0xb]] }
  0x56   :  { %v105_v24 = vrot.slane %v104_v23, 2  ;;  %s406_s10 = sld [smem:[#allocation8 + $0xb]] }
  0x58   :  { %v106_v26 = vadd.f32 %v105_v24, %v104_v23  ;;  %v186_v23 = vstv %s375_s21 }
  0x59   :  { %vm187_vm11 = vcmp.eq.s32.totalorder %v542_v1, %v186_v23 }
  0x5a   :  { %v107_v27 = vrot.slane %v106_v26, 1  ;;  %v378_v29 = vsel %vm187_vm11, 1.0, %v503_v4 }
  0x5c   :  { %v108_v30 = vadd.f32 %v107_v27, %v106_v26  ;;  %v197_v26 = vstv %s376_s22  ;;  %v204_v27 = vstv %s379_s23 }
  0x5d   :  { %vm205_vm12 = vcmp.eq.s32.totalorder %v542_v1, %v204_v27 }
  0x5e   :  { %v110_v32 = vmul.f32 %v109_v28, %v108_v30 }
  0x60   :  { %v111_v33 = vmul.f32 %v358_v31, %v110_v32  ;;  %v382_v32 = vsel %vm205_vm12, 1.0, %v503_v4 }
  0x62   :  { %v112_v35 = vadd.f32 %v111_v33, %v90_v20 }
  0x64   :  { %v124_v36 = vmul.f32 %v362_v34, %v112_v35 }
  0x66   :  { %v125_v37 = vrot.slane %v124_v36, 4 }
  0x68   :  { %v126_v38 = vadd.f32 %v125_v37, %v124_v36 }
  0x6a   :  { %v127_v39 = vrot.slane %v126_v38, 2 }
  0x6c   :  { %v128_v41 = vadd.f32 %v127_v39, %v126_v38  ;;  %v208_v38 = vstv %s380_s1 }
  0x6d   :  { %vm209_vm13 = vcmp.eq.s32.totalorder %v542_v1, %v208_v38 }
  0x6e   :  { %v129_v42 = vrot.slane %v128_v41, 1  ;;  %v383_v44 = vsel %vm209_vm13, 1.0, %v503_v4 }
  0x70   :  { %v130_v45 = vadd.f32 %v129_v42, %v128_v41  ;;  %v219_v41 = vstv %s381_s0  ;;  %v226_v42 = vstv %s384_s24 }
  0x71   :  { %vm227_vm14 = vcmp.eq.s32.totalorder %v542_v1, %v226_v42 }
  0x72   :  { %v132_v47 = vmul.f32 %v131_v43, %v130_v45 }
  0x74   :  { %v133_v48 = vmul.f32 %v363_v46, %v132_v47  ;;  %v387_v47 = vsel %vm227_vm14, 1.0, %v503_v4 }
  0x76   :  { %v134_v50 = vadd.f32 %v133_v48, %v112_v35 }
  0x78   :  { %v146_v51 = vmul.f32 %v367_v49, %v134_v50 }
  0x7a   :  { %v147_v52 = vrot.slane %v146_v51, 4 }
  0x7c   :  { %v148_v53 = vadd.f32 %v147_v52, %v146_v51 }
  0x7e   :  { %v149_v54 = vrot.slane %v148_v53, 2 }
  0x80   :  { %v150_v56 = vadd.f32 %v149_v54, %v148_v53  ;;  %v230_v53 = vstv %s385_s25 }
  0x81   :  { %vm231_vm15 = vcmp.eq.s32.totalorder %v542_v1, %v230_v53 }
  0x82   :  { %v151_v57 = vrot.slane %v150_v56, 1  ;;  %v388_v59 = vsel %vm231_vm15, 1.0, %v503_v4 }
  0x84   :  { %v152_v60 = vadd.f32 %v151_v57, %v150_v56  ;;  %v241_v56 = vstv %s386_s26  ;;  %v248_v57 = vstv %s389_s27 }
  0x85   :  { %vm249_vm0 = vcmp.eq.s32.totalorder %v542_v1, %v248_v57 }
  0x86   :  { %v154_v62 = vmul.f32 %v153_v58, %v152_v60 }
  0x88   :  { %v155_v63 = vmul.f32 %v368_v61, %v154_v62  ;;  %v392_v62 = vsel %vm249_vm0, 1.0, %v503_v4 }
  0x8a   :  { %v156_v2 = vadd.f32 %v155_v63, %v134_v50 }
  0x8c   :  { %v168_v3 = vmul.f32 %v372_v0, %v156_v2 }
  0x8e   :  { %v169_v5 = vrot.slane %v168_v3, 4 }
  0x90   :  { %v170_v6 = vadd.f32 %v169_v5, %v168_v3 }
  0x92   :  { %v171_v7 = vrot.slane %v170_v6, 2 }
  0x94   :  { %v172_v9 = vadd.f32 %v171_v7, %v170_v6  ;;  %v252_v6 = vstv %s390_s28 }
  0x95   :  { %vm253_vm1 = vcmp.eq.s32.totalorder %v542_v1, %v252_v6 }
  0x96   :  { %v173_v10 = vrot.slane %v172_v9, 1  ;;  %v393_v12 = vsel %vm253_vm1, 1.0, %v503_v4 }
  0x98   :  { %v174_v13 = vadd.f32 %v173_v10, %v172_v9  ;;  %v263_v9 = vstv %s391_s29  ;;  %v270_v10 = vstv %s394_s30 }
  0x99   :  { %vm271_vm2 = vcmp.eq.s32.totalorder %v542_v1, %v270_v10 }
  0x9a   :  { %v176_v15 = vmul.f32 %v175_v11, %v174_v13 }
  0x9c   :  { %v177_v16 = vmul.f32 %v373_v14, %v176_v15  ;;  %v397_v15 = vsel %vm271_vm2, 1.0, %v503_v4 }
  0x9e   :  { %v178_v18 = vadd.f32 %v177_v16, %v156_v2 }
  0xa0   :  { %v190_v19 = vmul.f32 %v377_v17, %v178_v18 }
  0xa2   :  { %v191_v20 = vrot.slane %v190_v19, 4 }
  0xa4   :  { %v192_v21 = vadd.f32 %v191_v20, %v190_v19 }
  0xa6   :  { %v193_v22 = vrot.slane %v192_v21, 2 }
  0xa8   :  { %v194_v24 = vadd.f32 %v193_v22, %v192_v21  ;;  %v274_v21 = vstv %s395_s2 }
  0xa9   :  { %vm275_vm3 = vcmp.eq.s32.totalorder %v542_v1, %v274_v21 }
  0xaa   :  { %v195_v25 = vrot.slane %v194_v24, 1  ;;  %v398_v27 = vsel %vm275_vm3, 1.0, %v503_v4 }
  0xac   :  { %v196_v28 = vadd.f32 %v195_v25, %v194_v24  ;;  %v285_v24 = vstv %s396_s5  ;;  %v292_v25 = vstv %s399_s6 }
  0xad   :  { %vm293_vm4 = vcmp.eq.s32.totalorder %v542_v1, %v292_v25 }
  0xae   :  { %v198_v30 = vmul.f32 %v197_v26, %v196_v28 }
  0xb0   :  { %v199_v31 = vmul.f32 %v378_v29, %v198_v30  ;;  %v402_v30 = vsel %vm293_vm4, 1.0, %v503_v4 }
  0xb2   :  { %v200_v33 = vadd.f32 %v199_v31, %v178_v18 }
  0xb4   :  { %v212_v34 = vmul.f32 %v382_v32, %v200_v33 }
  0xb6   :  { %v213_v35 = vrot.slane %v212_v34, 4 }
  0xb8   :  { %v214_v36 = vadd.f32 %v213_v35, %v212_v34 }
  0xba   :  { %v215_v37 = vrot.slane %v214_v36, 2 }
  0xbc   :  { %v216_v39 = vadd.f32 %v215_v37, %v214_v36  ;;  %v296_v36 = vstv %s400_s7 }
  0xbd   :  { %vm297_vm5 = vcmp.eq.s32.totalorder %v542_v1, %v296_v36 }
  0xbe   :  { %v217_v40 = vrot.slane %v216_v39, 1  ;;  %v403_v42 = vsel %vm297_vm5, 1.0, %v503_v4 }
  0xc0   :  { %v218_v43 = vadd.f32 %v217_v40, %v216_v39  ;;  %v307_v39 = vstv %s401_s3  ;;  %v314_v40 = vstv %s404_s8 }
  0xc1   :  { %vm315_vm6 = vcmp.eq.s32.totalorder %v542_v1, %v314_v40 }
  0xc2   :  { %v220_v45 = vmul.f32 %v219_v41, %v218_v43 }
  0xc4   :  { %v221_v46 = vmul.f32 %v383_v44, %v220_v45  ;;  %v407_v45 = vsel %vm315_vm6, 1.0, %v503_v4 }
  0xc6   :  { %v222_v48 = vadd.f32 %v221_v46, %v200_v33 }
  0xc8   :  { %v234_v49 = vmul.f32 %v387_v47, %v222_v48 }
  0xca   :  { %v235_v50 = vrot.slane %v234_v49, 4 }
  0xcc   :  { %v236_v51 = vadd.f32 %v235_v50, %v234_v49 }
  0xce   :  { %v237_v52 = vrot.slane %v236_v51, 2 }
  0xd0   :  { %v238_v54 = vadd.f32 %v237_v52, %v236_v51  ;;  %v318_v51 = vstv %s405_s9 }
  0xd1   :  { %vm319_vm7 = vcmp.eq.s32.totalorder %v542_v1, %v318_v51 }
  0xd2   :  { %v239_v55 = vrot.slane %v238_v54, 1 }
  0xd4   :  { %v240_v58 = vadd.f32 %v239_v55, %v238_v54  ;;  %v329_v54 = vstv %s406_s10 }
  0xd6   :  { %v242_v60 = vmul.f32 %v241_v56, %v240_v58  ;;  %v408_v56 = vsel %vm319_vm7, 1.0, %v503_v4 }
  0xd8   :  { %v243_v61 = vmul.f32 %v388_v59, %v242_v60 }
  0xda   :  { %v244_v63 = vadd.f32 %v243_v61, %v222_v48 }
  0xdc   :  { %v256_v0 = vmul.f32 %v392_v62, %v244_v63 }
  0xde   :  { %v257_v2 = vrot.slane %v256_v0, 4 }
  0xe0   :  { %v258_v3 = vadd.f32 %v257_v2, %v256_v0 }
  0xe2   :  { %v259_v5 = vrot.slane %v258_v3, 2 }
  0xe4   :  { %v260_v7 = vadd.f32 %v259_v5, %v258_v3 }
  0xe6   :  { %v261_v8 = vrot.slane %v260_v7, 1 }
  0xe8   :  { %v262_v11 = vadd.f32 %v261_v8, %v260_v7 }
  0xea   :  { %v264_v13 = vmul.f32 %v263_v9, %v262_v11 }
  0xec   :  { %v265_v14 = vmul.f32 %v393_v12, %v264_v13 }
  0xee   :  { %v266_v16 = vadd.f32 %v265_v14, %v244_v63 }
  0xf0   :  { %v278_v17 = vmul.f32 %v397_v15, %v266_v16 }
  0xf2   :  { %v279_v18 = vrot.slane %v278_v17, 4 }
  0xf4   :  { %v280_v19 = vadd.f32 %v279_v18, %v278_v17 }
  0xf6   :  { %v281_v20 = vrot.slane %v280_v19, 2 }
  0xf8   :  { %v282_v22 = vadd.f32 %v281_v20, %v280_v19 }
  0xfa   :  { %v283_v23 = vrot.slane %v282_v22, 1 }
  0xfc   :  { %v284_v26 = vadd.f32 %v283_v23, %v282_v22 }
  0xfe   :  { %v286_v28 = vmul.f32 %v285_v24, %v284_v26 }
 0x100   :  { %v287_v29 = vmul.f32 %v398_v27, %v286_v28 }
 0x102   :  { %v288_v31 = vadd.f32 %v287_v29, %v266_v16 }
 0x104   :  { %v300_v32 = vmul.f32 %v402_v30, %v288_v31 }
 0x106   :  { %v301_v33 = vrot.slane %v300_v32, 4 }
 0x108   :  { %v302_v34 = vadd.f32 %v301_v33, %v300_v32 }
 0x10a   :  { %v303_v35 = vrot.slane %v302_v34, 2 }
 0x10c   :  { %v304_v37 = vadd.f32 %v303_v35, %v302_v34 }
 0x10e   :  { %v305_v38 = vrot.slane %v304_v37, 1 }
 0x110   :  { %v306_v41 = vadd.f32 %v305_v38, %v304_v37 }
 0x112   :  { %v308_v43 = vmul.f32 %v307_v39, %v306_v41 }
 0x114   :  { %v309_v44 = vmul.f32 %v403_v42, %v308_v43 }
 0x116   :  { %v310_v46 = vadd.f32 %v309_v44, %v288_v31 }
 0x118   :  { %v322_v47 = vmul.f32 %v407_v45, %v310_v46 }
 0x11a   :  { %v323_v48 = vrot.slane %v322_v47, 4 }
 0x11c   :  { %v324_v49 = vadd.f32 %v323_v48, %v322_v47 }
 0x11e   :  { %v325_v50 = vrot.slane %v324_v49, 2 }
 0x120   :  { %v326_v52 = vadd.f32 %v325_v50, %v324_v49 }
 0x122   :  { %v327_v53 = vrot.slane %v326_v52, 1 }
 0x124   :  { %v328_v55 = vadd.f32 %v327_v53, %v326_v52 }
 0x126   :  { %v330_v57 = vmul.f32 %v329_v54, %v328_v55 }
 0x128   :  { %v331_v58 = vmul.f32 %v408_v56, %v330_v57 }
 0x12a   :  { %v332_v59 = vadd.f32 %v331_v58, %v310_v46 }
 0x12c   :  { %v333_v60 = vmax.f32 %v332_v59, 0.0 }
 0x12e   :  { %334 = vst [vmem:[#allocation10] sm:$0xff] %v333_v60 }
 0x12f   :  { %482 = shalt.err (!%p479_p10)
}
 0x130   :  { %344 = dma.vmem_to_hbm [thread:$0]  %s342_s12, 128, %s599_s4, [#allocation4]  }
 0x131   :  { %497 = dma.done.wait [#allocation4], 128  }
 0x132   :  { %498 = vsyncadd [#allocation4], 4294967168 }
 0x133   :  { %348 = vsyncpa [#allocation3], 1 }
 0x134   :  { %349 = vsyncpa [#allocation4], 1 }
 0x135   :  { %350 = vsyncpa [#allocation5], 1 }
 0x136   :  { %351 = vsyncpa [#allocation7], 1 }

// kernel: graph_convolution_layer.2
= control target key start
LH: loop header
LB: loop body
LE: loop exit
PB: predicated region body
PF: predicated region fallthrough
CT: control target
= control target key end

     0   :  { %v215_v1 = vmov 0.0   ;;  %vm216_vm0 = vmmov 0   ;;  %s295_s0 = inlined_call_operand.vmem [shape: f32[8,128], index: 0, kind: input, shape index: {}]   ;;  %s296_s1 = inlined_call_operand.vmem [shape: f32[128,128], index: 1, kind: input, shape index: {}]   ;;  %s297_s2 = inlined_call_operand.vmem [shape: f32[1,128], index: 2, kind: input, shape index: {}]   ;;  %s298_s3 = inlined_call_operand.hbm [shape: f32[8,128], index: 3, kind: output, shape index: {}]  }
   0x1   :  { %v37_v0 = vld [vmem:[%s296_s1 + $0x78] sm:$0xff]  ;;  %155 = vmatprep.subr.mxu0 %v215_v1  ;;  %187 = vmatprep.mubr.msk.f32.mxu0 %vm216_vm0, %v215_v1  ;;  %v36_v2 = vld [vmem:[%s296_s1 + $0x70] sm:$0xff] }
   0x2   :  { %156 = vmatpush3.xpose.msra.mxu0 %v37_v0 }
   0x3   :  { %157 = vmatprep.subr.mxu0 %v215_v1 }
   0x4   :  { %8 = vsyncpa [#allocation4], 0  ;;  %v35_v3 = vld [vmem:[%s296_s1 + $0x68] sm:$0xff]  ;;  %v34_v4 = vld [vmem:[%s296_s1 + $0x60] sm:$0xff]  ;;  %s217_s21 = smov [#allocation3]  }
   0x5   :  { %v33_v5 = vld [vmem:[%s296_s1 + $0x58] sm:$0xff]  ;;  %v32_v6 = vld [vmem:[%s296_s1 + $0x50] sm:$0xff]  ;;  %v31_v7 = vld [vmem:[%s296_s1 + $0x48] sm:$0xff]  ;;  %s129_s22 = sshll.u32 %s217_s21, 4  ;;  %s130_s22 = int_to_ptr.vmem [resolvable:$true] %s129_s22 }
   0x6   :  { %158 = vmatpush3.xpose.msra.mxu0 %v36_v2  ;;  %v30_v8 = vld [vmem:[%s296_s1 + $0x40] sm:$0xff]  ;;  %v29_v9 = vld [vmem:[%s296_s1 + $0x38] sm:$0xff]  ;;  %v28_v10 = vld [vmem:[%s296_s1 + $0x30] sm:$0xff]  ;;  %s193_s23 = scalar_lea.vmem %s130_s22, 128  ;;  %p198_p1 = scmp.lt.s32.totalorder %s130_s22, %s130_s22 }
   0x7   :  { %159 = vmatprep.subr.mxu0 %v215_v1  ;;  %v27_v11 = vld [vmem:[%s296_s1 + $0x28] sm:$0xff]  ;;  %v26_v12 = vld [vmem:[%s296_s1 + $0x20] sm:$0xff]  ;;  %v25_v13 = vld [vmem:[%s296_s1 + $0x18] sm:$0xff]  ;;  %p194_p0 = scmp.ne.s32.totalorder %s130_s22, %s193_s23  ;;  %p199_p2 = scmp.lt.s32.totalorder %s193_s23, %s193_s23 }
   0x8   :  { %v24_v14 = vld [vmem:[%s296_s1 + $0x10] sm:$0xff]  ;;  %v23_v15 = vld [vmem:[%s296_s1 + $0x8] sm:$0xff]  ;;  %v22_v16 = vld [vmem:[%s296_s1] sm:$0xff] }
   0x9   :  { %v21_v17 = vld [vmem:[%s295_s0] sm:$0xff]  ;;  %p200_p3 = por %p199_p2, %p198_p1 }
   0xa   :  { %160 = vmatpush3.xpose.msra.mxu0 %v35_v3  ;;  %v137_v18 = vld [vmem:[%s297_s2] ss:$0 sm:$0xff] }
   0xb   :  { %161 = vmatprep.subr.mxu0 %v215_v1  ;;  %p201_p4 = pnand %p200_p3, %p194_p0 }
   0xe   :  { %162 = vmatpush3.xpose.msra.mxu0 %v34_v4 }
   0xf   :  { %163 = vmatprep.subr.mxu0 %v215_v1 }
  0x12   :  { %164 = vmatpush3.xpose.msra.mxu0 %v33_v5 }
  0x13   :  { %165 = vmatprep.subr.mxu0 %v215_v1 }
  0x16   :  { %166 = vmatpush3.xpose.msra.mxu0 %v32_v6 }
  0x17   :  { %167 = vmatprep.subr.mxu0 %v215_v1 }
  0x1a   :  { %168 = vmatpush3.xpose.msra.mxu0 %v31_v7 }
  0x1b   :  { %169 = vmatprep.subr.mxu0 %v215_v1 }
  0x1e   :  { %170 = vmatpush3.xpose.msra.mxu0 %v30_v8 }
  0x1f   :  { %171 = vmatprep.subr.mxu0 %v215_v1 }
  0x22   :  { %172 = vmatpush3.xpose.msra.mxu0 %v29_v9 }
  0x23   :  { %173 = vmatprep.subr.mxu0 %v215_v1 }
  0x26   :  { %174 = vmatpush3.xpose.msra.mxu0 %v28_v10 }
  0x27   :  { %175 = vmatprep.subr.mxu0 %v215_v1 }
  0x2a   :  { %176 = vmatpush3.xpose.msra.mxu0 %v27_v11 }
  0x2b   :  { %177 = vmatprep.subr.mxu0 %v215_v1 }
  0x2e   :  { %178 = vmatpush3.xpose.msra.mxu0 %v26_v12 }
  0x2f   :  { %179 = vmatprep.subr.mxu0 %v215_v1 }
  0x32   :  { %180 = vmatpush3.xpose.msra.mxu0 %v25_v13 }
  0x33   :  { %181 = vmatprep.subr.mxu0 %v215_v1 }
  0x36   :  { %182 = vmatpush3.xpose.msra.mxu0 %v24_v14 }
  0x37   :  { %183 = vmatprep.subr.mxu0 %v215_v1 }
  0x3a   :  { %184 = vmatpush3.xpose.msra.mxu0 %v23_v15 }
  0x3b   :  { %185 = vmatprep.subr.mxu0 %v215_v1 }
  0x3e   :  { %186 = vmatpush3.xpose.msra.mxu0 %v22_v16 }
  0x41   :  { %188 = vmatmul.mubr.f32.vlgmr.msra.gmra.mxu0 %v21_v17 }
 0x101   :  { %v104_v19 = vpop.f32.mrf.mxu0 }
 0x102   :  { %v121_v20 = vadd.f32 %v137_v18, %v104_v19 }
 0x103   :  { %v189_v21 = vpop.f32.mrf.mxu0 }
 0x104   :  { %122 = vst [vmem:[#allocation3] sm:$0xff] %v121_v20 }
 0x105   :  { %204 = shalt.err (!%p201_p4)
}
 0x106   :  { %132 = dma.vmem_to_hbm [thread:$0]  %s130_s22, 128, %s298_s3, [#allocation4]  }
 0x107   :  { %213 = dma.done.wait [#allocation4], 128  }
 0x108   :  { %214 = vsyncadd [#allocation4], 4294967168 }
 0x109   :  { %136 = vsyncpa [#allocation4], 1 }

</bundles_post_ra>
